<compile_context>
chip_gen: v6e
topology: v6e:2x2x1
jax: 0.10.0
libtpu: 0.0.40
codegen_flags: <defaults>
</compile_context>

<pallas_src>
import functools
import math

import jax
import jax.numpy as jnp
import numpy as np
from jax import lax
from jax.experimental import pallas as pl
from jax.experimental.pallas import tpu as pltpu

_VMEM_LIMIT = 32 * 1024 * 1024   # scoped-VMEM budget valid on v5e / v6e / v7x
_TILE_BUDGET = 2 * 1024 * 1024   # target bytes for the largest activation block per tile


def _largest_divisor_le(n, limit):
    limit = max(1, min(n, limit))
    for t in range(limit, 0, -1):
        if n % t == 0:
            return t
    return 1


def _pick_tile_rows(h, bytes_per_row, budget=_TILE_BUDGET):
    """Largest divisor of `h` whose row block stays under the VMEM byte budget."""
    return _largest_divisor_le(h, max(1, budget // max(1, bytes_per_row)))


# ---------------------------------------------------------------------------
# 1x1 conv + folded BN + ReLU
# ---------------------------------------------------------------------------

def _conv1x1_bn_relu_kernel(x_ref, w_ref, scale_ref, shift_ref, o_ref):
    # x_ref: (1, TH, W, Cin) bf16   w_ref: (Cin, Cout) bf16
    # scale/shift: (1, Cout) f32    o_ref: (1, TH, W, Cout)
    _, th, w, cin = x_ref.shape
    cout = o_ref.shape[-1]
    x = x_ref[0].reshape(th * w, cin)
    y = jnp.dot(x, w_ref[...], preferred_element_type=jnp.float32)
    y = y * scale_ref[...] + shift_ref[...]
    y = jnp.maximum(y, 0.0)
    o_ref[...] = y.reshape(1, th, w, cout).astype(o_ref.dtype)


def conv1x1_bn_relu(x, w, scale, shift, out_dtype=jnp.bfloat16):
    n, h, wd, cin = x.shape
    cout = w.shape[1]
    th = _pick_tile_rows(h, wd * (cin + cout) * 2)
    return pl.pallas_call(
        _conv1x1_bn_relu_kernel,
        out_shape=jax.ShapeDtypeStruct((n, h, wd, cout), out_dtype),
        grid=(n, h // th),
        in_specs=[
            pl.BlockSpec((1, th, wd, cin), lambda b, i: (b, i, 0, 0)),
            pl.BlockSpec((cin, cout), lambda b, i: (0, 0)),
            pl.BlockSpec((1, cout), lambda b, i: (0, 0)),
            pl.BlockSpec((1, cout), lambda b, i: (0, 0)),
        ],
        out_specs=pl.BlockSpec((1, th, wd, cout), lambda b, i: (b, i, 0, 0)),
        compiler_params=pltpu.CompilerParams(
            dimension_semantics=("parallel", "parallel"),
            vmem_limit_bytes=_VMEM_LIMIT),
    )(x, w, scale, shift)


# ---------------------------------------------------------------------------
# Separable bilinear upsample (align_corners=False):  y = M_h @ x @ M_w^T
# ---------------------------------------------------------------------------

def _bilinear_matrix(in_size, out_size):
    # PyTorch F.interpolate(mode='bilinear', align_corners=False) along one axis.
    scale = in_size / out_size
    o = np.arange(out_size)
    src = np.maximum((o + 0.5) * scale - 0.5, 0.0)
    i0 = np.minimum(np.floor(src).astype(np.int64), in_size - 1)
    i1 = np.minimum(i0 + 1, in_size - 1)
    w1 = (src - i0).astype(np.float32)
    w0 = 1.0 - w1
    m = np.zeros((out_size, in_size), dtype=np.float32)
    np.add.at(m, (o, i0), w0)
    np.add.at(m, (o, i1), w1)
    return m


def _upsample_h_kernel(x_ref, mh_ref, o_ref):
    # x_ref: (1, Hi, Wi*C) bf16   mh_ref: (Ho, Hi) f32   o_ref: (1, Ho, Wi*C) f32
    x = x_ref[0].astype(jnp.float32)
    o_ref[0] = jnp.dot(mh_ref[...], x, preferred_element_type=jnp.float32)


def _upsample_w_kernel(x_ref, mw_ref, o_ref):
    # x_ref: (1, THo, Wi, C) f32   mw_ref: (Wo, Wi) f32   o_ref: (1, THo, Wo, C) bf16
    tho = x_ref.shape[1]
    mw = mw_ref[...]
    for t in range(tho):  # static unroll; THo kept small
        row = jnp.dot(mw, x_ref[0, t], preferred_element_type=jnp.float32)
        o_ref[0, t] = row.astype(o_ref.dtype)


def bilinear_upsample(x, ho, wo, out_dtype=jnp.bfloat16):
    """Separable bilinear resize of an NHWC tensor to (ho, wo)."""
    n, hi, wi, c = x.shape
    mh = jnp.asarray(_bilinear_matrix(hi, ho))  # (Ho, Hi)  ~KB, not a kron matrix
    mw = jnp.asarray(_bilinear_matrix(wi, wo))  # (Wo, Wi)

    # --- H axis: one clean 2-D matmul per image (contiguous host reshape) ---
    x2 = x.reshape(n, hi, wi * c)
    y1 = pl.pallas_call(
        _upsample_h_kernel,
        out_shape=jax.ShapeDtypeStruct((n, ho, wi * c), jnp.float32),
        grid=(n,),
        in_specs=[
            pl.BlockSpec((1, hi, wi * c), lambda b: (b, 0, 0)),
            pl.BlockSpec((ho, hi), lambda b: (0, 0)),
        ],
        out_specs=pl.BlockSpec((1, ho, wi * c), lambda b: (b, 0, 0)),
        compiler_params=pltpu.CompilerParams(
            dimension_semantics=("parallel",),
            vmem_limit_bytes=_VMEM_LIMIT),
    )(x2, mh)
    y1 = y1.reshape(n, ho, wi, c)

    # --- W axis: row-tiled, channels stay on the lane dim ---
    tho = _largest_divisor_le(ho, 16)
    out = pl.pallas_call(
        _upsample_w_kernel,
        out_shape=jax.ShapeDtypeStruct((n, ho, wo, c), out_dtype),
        grid=(n, ho // tho),
        in_specs=[
            pl.BlockSpec((1, tho, wi, c), lambda b, i: (b, i, 0, 0)),
            pl.BlockSpec((wo, wi), lambda b, i: (0, 0)),
        ],
        out_specs=pl.BlockSpec((1, tho, wo, c), lambda b, i: (b, i, 0, 0)),
        compiler_params=pltpu.CompilerParams(
            dimension_semantics=("parallel", "parallel"),
            vmem_limit_bytes=_VMEM_LIMIT),
    )(y1, mw)
    return out


# ---------------------------------------------------------------------------
# 3x3 "same" conv (stride 1) with fused channel-concat, folded BN and ReLU
# ---------------------------------------------------------------------------

def _conv3x3_kernel(*refs, num_srcs, apply_bn, apply_relu):
    # refs layout: [(xc, x_top, x_bot) * num_srcs, w * num_srcs, (scale, shift)?, o, acc]
    #   xc:    (1, TH, W, C_s) bf16  current row tile
    #   x_top: (1, 1,  W, C_s) bf16  row above the tile (clamped; zeroed on the first tile)
    #   x_bot: (1, 1,  W, C_s) bf16  row below the tile (clamped; zeroed on the last tile)
    #   w:     (9, C_s, Cout)  bf16  taps in (ky, kx) row-major order
    #   scale/shift: (1, Cout) f32   folded BatchNorm (only when apply_bn)
    #   o:     (1, TH, W, Cout)
    #   acc:   (TH*W, Cout)    f32   VMEM scratch accumulator
    nx = 3 * num_srcs
    x_refs = refs[:nx]
    w_refs = refs[nx:nx + num_srcs]
    pos = nx + num_srcs
    if apply_bn:
        scale_ref, shift_ref = refs[pos], refs[pos + 1]
        pos += 2
    o_ref = refs[pos]
    acc_ref = refs[pos + 1]

    i = pl.program_id(1)
    nt = pl.num_programs(1)
    _, th, w, cout = o_ref.shape

    acc_ref[...] = jnp.zeros_like(acc_ref)

    for s in range(num_srcs):
        xc_ref, xt_ref, xb_ref = x_refs[3 * s:3 * s + 3]
        w_ref = w_refs[s]
        c = xc_ref.shape[-1]
        dtype = xc_ref.dtype

        x0 = xc_ref[0]                                  # (TH, W, C)
        # halo rows; zeroed at the image border (they hold clamped rows there)
        top = xt_ref[0] * (i > 0).astype(dtype)         # (1, W, C)
        bot = xb_ref[0] * (i < nt - 1).astype(dtype)    # (1, W, C)

        # input rows (r + ky - 1) for ky = 0, 1, 2
        if th > 1:
            rows_by_ky = (
                jnp.concatenate([top, x0[:th - 1]], axis=0),
                x0,
                jnp.concatenate([x0[1:], bot], axis=0),
            )
        else:
            rows_by_ky = (top, x0, bot)

        zero_col = jnp.zeros((th, 1, c), dtype)
        for ky in range(3):
            rows = rows_by_ky[ky]
            # input cols (wc + kx - 1) for kx = 0, 1, 2 with zero padding at the W border.
            # TODO(synk): these column shifts could use pltpu.roll + a border mask to move
            #             the shift onto the otherwise-idle XLU slot.
            patches = (
                jnp.concatenate([zero_col, rows[:, :w - 1, :]], axis=1),
                rows,
                jnp.concatenate([rows[:, 1:, :], zero_col], axis=1),
            )
            for kx in range(3):
                acc_ref[...] += jnp.dot(
                    patches[kx].reshape(th * w, c), w_ref[ky * 3 + kx],
                    preferred_element_type=jnp.float32)

    y = acc_ref[...]
    if apply_bn:
        y = y * scale_ref[...] + shift_ref[...]
    if apply_relu:
        y = jnp.maximum(y, 0.0)
    o_ref[...] = y.reshape(1, th, w, cout).astype(o_ref.dtype)


def conv3x3_bn_act(xs, ws, scale, shift, *, apply_relu, out_dtype):
    """3x3 'same' conv over the virtual channel-concat of `xs` (fused; no HBM concat)."""
    n, h, w, _ = xs[0].shape
    cout = ws[0].shape[-1]
    apply_bn = scale is not None

    c_total = sum(int(x.shape[-1]) for x in xs)
    th = _pick_tile_rows(h, w * (c_total * 2 + cout * 2 + cout * 4))
    nt = h // th

    in_specs = []
    args = []
    for x in xs:
        c = int(x.shape[-1])
        in_specs.append(pl.BlockSpec((1, th, w, c), lambda b, i: (b, i, 0, 0)))
        # 1-row halos fetched as extra inputs (block size 1 along H => row index),
        # clamped at the image border and zeroed inside the kernel.
        in_specs.append(pl.BlockSpec(
            (1, 1, w, c), lambda b, i: (b, jnp.maximum(i * th - 1, 0), 0, 0)))
        in_specs.append(pl.BlockSpec(
            (1, 1, w, c), lambda b, i: (b, jnp.minimum(i * th + th, h - 1), 0, 0)))
        args += [x, x, x]
    for wt in ws:
        in_specs.append(pl.BlockSpec(wt.shape, lambda b, i: (0, 0, 0)))
        args.append(wt)
    if apply_bn:
        in_specs.append(pl.BlockSpec((1, cout), lambda b, i: (0, 0)))
        in_specs.append(pl.BlockSpec((1, cout), lambda b, i: (0, 0)))
        args += [scale, shift]

    kernel = functools.partial(
        _conv3x3_kernel, num_srcs=len(xs), apply_bn=apply_bn, apply_relu=apply_relu)
    return pl.pallas_call(
        kernel,
        out_shape=jax.ShapeDtypeStruct((n, h, w, cout), out_dtype),
        grid=(n, nt),
        in_specs=in_specs,
        out_specs=pl.BlockSpec((1, th, w, cout), lambda b, i: (b, i, 0, 0)),
        scratch_shapes=[pltpu.VMEM((th * w, cout), jnp.float32)],
        compiler_params=pltpu.CompilerParams(
            dimension_semantics=("parallel", "parallel"),
            vmem_limit_bytes=_VMEM_LIMIT),
    )(*args)


# ---------------------------------------------------------------------------
# Parameters / BN folding
# ---------------------------------------------------------------------------

def bn_fold(gamma, beta, mean, var, eps=1e-5):
    scale = gamma / jnp.sqrt(var + eps)
    shift = beta - mean * scale
    return scale[None, :].astype(jnp.float32), shift[None, :].astype(jnp.float32)


def init_params(key, in_channels, out_channels, num_classes, high_channels):
    ks = jax.random.split(key, 4)

    def kaiming_hwio(k, shape):  # shape = (kh, kw, Cin, Cout), fan_in = kh*kw*Cin
        fan_in = shape[0] * shape[1] * shape[2]
        std = math.sqrt(2.0 / fan_in)
        return std * jax.random.normal(k, shape, jnp.float32)

    params = {
        "conv1_w": kaiming_hwio(ks[0], (1, 1, in_channels, high_channels)),
        "cls0_w": kaiming_hwio(ks[1], (3, 3, out_channels + high_channels, out_channels)),
        "cls1_w": kaiming_hwio(ks[2], (3, 3, out_channels, out_channels)),
        "cls2_w": kaiming_hwio(ks[3], (3, 3, out_channels, num_classes)),
    }
    for name, c in (("bn1", high_channels), ("bn_c0", out_channels), ("bn_c1", out_channels)):
        params[name] = dict(
            gamma=jnp.ones((c,), jnp.float32),   # BatchNorm weight filled with 1
            beta=jnp.zeros((c,), jnp.float32),   # bias zeroed
            mean=jnp.zeros((c,), jnp.float32),   # running_mean default
            var=jnp.ones((c,), jnp.float32),     # running_var default
        )
    return params


# ---------------------------------------------------------------------------
# Decoder forward (Pallas)
# ---------------------------------------------------------------------------

def decoder_forward(x_nchw, x_low_nchw, params, with_features=False):
    # NCHW -> NHWC (channels on the lane dim); bf16 activations for the MXU.
    x = jnp.transpose(x_nchw, (0, 2, 3, 1)).astype(jnp.bfloat16)
    xl = jnp.transpose(x_low_nchw, (0, 2, 3, 1)).astype(jnp.bfloat16)

    # conv1 (1x1) + bn1 + relu on the low-level features
    s1, b1 = bn_fold(**params["bn1"])
    w1 = params["conv1_w"][0, 0].astype(jnp.bfloat16)           # (Cin, Ch)
    xl = conv1x1_bn_relu(xl, w1, s1, b1)                        # (N, Hl, Wl, Ch) bf16

    # separable bilinear upsample of x to the low-level spatial size (align_corners=False)
    _, hl, wl, _ = xl.shape
    x_up = bilinear_upsample(x, hl, wl)                         # (N, Hl, Wl, Cx) bf16

    # classifier conv 1: channel concat (x_up ++ xl) fused into the conv (two weight slabs)
    c_up = int(x_up.shape[-1])
    s2, b2 = bn_fold(**params["bn_c0"])
    w2 = params["cls0_w"].reshape(9, -1, params["cls0_w"].shape[3]).astype(jnp.bfloat16)
    y = conv3x3_bn_act([x_up, xl], [w2[:, :c_up, :], w2[:, c_up:, :]],
                       s2, b2, apply_relu=True, out_dtype=jnp.bfloat16)

    # classifier conv 2
    s3, b3 = bn_fold(**params["bn_c1"])
    w3 = params["cls1_w"].reshape(9, -1, params["cls1_w"].shape[3]).astype(jnp.bfloat16)
    y = conv3x3_bn_act([y], [w3], s3, b3, apply_relu=True, out_dtype=jnp.bfloat16)

    # classifier conv 3 (no BN / ReLU).  num_classes is padded up to 128 output lanes so the
    # kernel issues dense (unmasked) stores; the padding is stripped right after.
    nc = params["cls2_w"].shape[3]
    ncp = ((nc + 127) // 128) * 128
    w4 = params["cls2_w"].reshape(9, -1, nc).astype(jnp.bfloat16)
    w4 = jnp.pad(w4, ((0, 0), (0, 0), (0, ncp - nc)))
    y = conv3x3_bn_act([y], [w4], None, None, apply_relu=False, out_dtype=jnp.float32)
    y = y[..., :nc]

    out = jnp.transpose(y, (0, 3, 1, 2))                        # back to NCHW
    if with_features:
        # features only materialised when requested (the conv path never builds them)
        f = jnp.concatenate([x_up, xl], axis=-1).astype(jnp.float32)
        return out, jnp.transpose(f, (0, 3, 1, 2))
    return out


# ---------------------------------------------------------------------------
# Pure-JAX reference (mirrors the kernels' bf16 quantisation points)
# ---------------------------------------------------------------------------

def decoder_forward_ref(x_nchw, x_low_nchw, params):
    dn = ("NHWC", "HWIO", "NHWC")
    q = lambda a: a.astype(jnp.bfloat16).astype(jnp.float32)
    x = q(jnp.transpose(x_nchw, (0, 2, 3, 1)).astype(jnp.float32))
    xl = q(jnp.transpose(x_low_nchw, (0, 2, 3, 1)).astype(jnp.float32))

    def bn(v, p):
        s, b = bn_fold(**p)
        return v * s[0] + b[0]

    xl = lax.conv_general_dilated(xl, q(params["conv1_w"]), (1, 1), "VALID",
                                  dimension_numbers=dn)
    xl = q(jnp.maximum(bn(xl, params["bn1"]), 0.0))

    _, hl, wl, _ = xl.shape
    _, hx, wx, _ = x.shape
    mh = jnp.asarray(_bilinear_matrix(hx, hl))
    mw = jnp.asarray(_bilinear_matrix(wx, wl))
    x_up = jnp.einsum("oh,nhwc->nowc", mh, x)
    x_up = q(jnp.einsum("ow,nhwc->nhoc", mw, x_up))

    f = jnp.concatenate([x_up, xl], axis=-1)
    pad = ((1, 1), (1, 1))
    y = lax.conv_general_dilated(f, q(params["cls0_w"]), (1, 1), pad, dimension_numbers=dn)
    y = q(jnp.maximum(bn(y, params["bn_c0"]), 0.0))
    y = lax.conv_general_dilated(y, q(params["cls1_w"]), (1, 1), pad, dimension_numbers=dn)
    y = q(jnp.maximum(bn(y, params["bn_c1"]), 0.0))
    y = lax.conv_general_dilated(y, q(params["cls2_w"]), (1, 1), pad, dimension_numbers=dn)
    return jnp.transpose(y, (0, 3, 1, 2))


# ---------------------------------------------------------------------------
# Main
# ---------------------------------------------------------------------------

if __name__ == "__main__":
    in_channels, out_channels, num_classes, high_channels = 8, 16, 5, 32
    N, Hx, Wx, Hl, Wl = 2, 4, 4, 8, 8

    key = jax.random.PRNGKey(0)
    kx, kl, kp = jax.random.split(key, 3)
    x = jax.random.normal(kx, (N, out_channels, Hx, Wx), jnp.float32)      # high-level features
    x_low = jax.random.normal(kl, (N, in_channels, Hl, Wl), jnp.float32)   # low-level features
    params = init_params(kp, in_channels, out_channels, num_classes, high_channels)

    out, feats = decoder_forward(x, x_low, params, with_features=True)
    out = jax.block_until_ready(out)
    feats = jax.block_until_ready(feats)

    assert out.shape == (N, num_classes, Hl, Wl)
    assert feats.shape == (N, out_channels + high_channels, Hl, Wl)

    ref = jax.block_until_ready(decoder_forward_ref(x, x_low, params))
    np.testing.assert_allclose(np.asarray(out), np.asarray(ref), rtol=5e-2, atol=5e-2)

    print("KERNEL_OK")
</pallas_src>

<mosaic_0001>
module attributes {stable_mosaic.version = 11 : i64} {
  func.func @_conv1x1_bn_relu_kernel(%arg0: i32, %arg1: i32, %arg2: memref<1x8x8x8xbf16, #tpu.memory_space<vmem>>, %arg3: memref<8x32xbf16, #tpu.memory_space<vmem>>, %arg4: memref<1x32xf32, #tpu.memory_space<vmem>>, %arg5: memref<1x32xf32, #tpu.memory_space<vmem>>, %arg6: memref<1x8x8x32xbf16, #tpu.memory_space<vmem>>) attributes {dimension_semantics = [#tpu.dimension_semantics<parallel>, #tpu.dimension_semantics<parallel>], iteration_bounds = array<i64: 2, 1>, scalar_prefetch = 0 : i64, scratch_operands = 0 : i64, tpu.core_type = #tpu.core_type<tc>, window_params = [{transform_indices = @transform_0, window_bounds = array<i64: 1, 8, 8, 8>}, {pipeline_mode = #tpu.pipeline_mode<synchronous>, transform_indices = @transform_1, window_bounds = array<i64: 8, 32>}, {pipeline_mode = #tpu.pipeline_mode<synchronous>, transform_indices = @transform_2, window_bounds = array<i64: 1, 32>}, {pipeline_mode = #tpu.pipeline_mode<synchronous>, transform_indices = @transform_3, window_bounds = array<i64: 1, 32>}, {transform_indices = @transform_4, window_bounds = array<i64: 1, 8, 8, 32>}]} {
    %c0 = arith.constant 0 : index
    %c0_0 = arith.constant 0 : index
    %c0_1 = arith.constant 0 : index
    %c0_2 = arith.constant 0 : index
    %0 = vector.load %arg2[%c0, %c0_0, %c0_1, %c0_2] : memref<1x8x8x8xbf16, #tpu.memory_space<vmem>>, vector<1x8x8x8xbf16>
    %1 = vector.shape_cast %0 : vector<1x8x8x8xbf16> to vector<8x8x8xbf16>
    %2 = vector.shape_cast %1 : vector<8x8x8xbf16> to vector<64x8xbf16>
    %c0_3 = arith.constant 0 : index
    %c0_4 = arith.constant 0 : index
    %3 = vector.load %arg3[%c0_3, %c0_4] : memref<8x32xbf16, #tpu.memory_space<vmem>>, vector<8x32xbf16>
    %cst = arith.constant dense<0.000000e+00> : vector<64x32xf32>
    %4 = tpu.matmul %2, %3, %cst {dimension_numbers = #tpu.dot_dimension_numbers<[1], [0], [0], [1], [0, 0, 1, 1], [], []>} : vector<64x8xbf16>, vector<8x32xbf16>, vector<64x32xf32> -> vector<64x32xf32>
    %c0_5 = arith.constant 0 : index
    %c0_6 = arith.constant 0 : index
    %5 = vector.load %arg4[%c0_5, %c0_6] : memref<1x32xf32, #tpu.memory_space<vmem>>, vector<1x32xf32>
    %6 = vector.broadcast %5 : vector<1x32xf32> to vector<64x32xf32>
    %7 = arith.mulf %4, %6 : vector<64x32xf32>
    %c0_7 = arith.constant 0 : index
    %c0_8 = arith.constant 0 : index
    %8 = vector.load %arg5[%c0_7, %c0_8] : memref<1x32xf32, #tpu.memory_space<vmem>>, vector<1x32xf32>
    %9 = vector.broadcast %8 : vector<1x32xf32> to vector<64x32xf32>
    %10 = arith.addf %7, %9 : vector<64x32xf32>
    %cst_9 = arith.constant 0.000000e+00 : f32
    %11 = vector.broadcast %cst_9 : f32 to vector<64x32xf32>
    %12 = arith.maximumf %10, %11 : vector<64x32xf32>
    %13 = vector.shape_cast %12 : vector<64x32xf32> to vector<1x8x8x32xf32>
    %14 = arith.truncf %13 : vector<1x8x8x32xf32> to vector<1x8x8x32xbf16>
    %c0_10 = arith.constant 0 : index
    %c0_11 = arith.constant 0 : index
    %c0_12 = arith.constant 0 : index
    %c0_13 = arith.constant 0 : index
    %15 = vector.load %arg6[%c0_10, %c0_11, %c0_12, %c0_13] : memref<1x8x8x32xbf16, #tpu.memory_space<vmem>>, vector<1x8x8x32xbf16>
    tpu.vector_store %arg6[%c0_10, %c0_11, %c0_12, %c0_13], %14 {strides = array<i32>} : memref<1x8x8x32xbf16, #tpu.memory_space<vmem>>, vector<1x8x8x32xbf16>,
    return
  }
  func.func @transform_0(%arg0: i32, %arg1: i32) -> (i32, i32, i32, i32) {
    %c0_i32 = arith.constant 0 : i32
    %c0_i32_0 = arith.constant 0 : i32
    %c0_i32_1 = arith.constant 0 : i32
    return %arg0, %arg1, %c0_i32, %c0_i32_0 : i32, i32, i32, i32
  }
  func.func @transform_1(%arg0: i32, %arg1: i32) -> (i32, i32) {
    %c0_i32 = arith.constant 0 : i32
    %c0_i32_0 = arith.constant 0 : i32
    %c0_i32_1 = arith.constant 0 : i32
    return %c0_i32, %c0_i32_0 : i32, i32
  }
  func.func @transform_2(%arg0: i32, %arg1: i32) -> (i32, i32) {
    %c0_i32 = arith.constant 0 : i32
    %c0_i32_0 = arith.constant 0 : i32
    %c0_i32_1 = arith.constant 0 : i32
    return %c0_i32, %c0_i32_0 : i32, i32
  }
  func.func @transform_3(%arg0: i32, %arg1: i32) -> (i32, i32) {
    %c0_i32 = arith.constant 0 : i32
    %c0_i32_0 = arith.constant 0 : i32
    %c0_i32_1 = arith.constant 0 : i32
    return %c0_i32, %c0_i32_0 : i32, i32
  }
  func.func @transform_4(%arg0: i32, %arg1: i32) -> (i32, i32, i32, i32) {
    %c0_i32 = arith.constant 0 : i32
    %c0_i32_0 = arith.constant 0 : i32
    %c0_i32_1 = arith.constant 0 : i32
    return %arg0, %arg1, %c0_i32, %c0_i32_0 : i32, i32, i32, i32
  }
}

</mosaic_0001>

<bundles_post_ra>
// kernel: tpu_custom_call.1
= control target key start
LH: loop header
LB: loop body
LE: loop exit
PB: predicated region body
PF: predicated region fallthrough
CT: control target
= control target key end

     0   :  { %s1025_s0 = inlined_call_operand.hbm [shape: bf16[2,8,8,8], index: 0, kind: input, shape index: {}]   ;;  %s1026_s1 = inlined_call_operand.hbm [shape: bf16[8,32], index: 1, kind: input, shape index: {}]   ;;  %s1027_s2 = inlined_call_operand.vmem [shape: f32[1,32], index: 2, kind: input, shape index: {}]   ;;  %s1028_s3 = inlined_call_operand.vmem [shape: f32[1,32], index: 3, kind: input, shape index: {}]   ;;  %s1029_s4 = inlined_call_operand.hbm [shape: bf16[2,8,8,32], index: 4, kind: output, shape index: {}]  }
   0x1   :  { %1033 = sst [smem:[#allocation12_spill]] %s1026_s1 }
   0x2   :  { %9 = vsyncpa [#allocation3], 0 }
   0x3   :  { %11 = vsyncpa [#allocation3 + $0x1], 0 }
   0x4   :  { %12 = vsyncpa [#allocation6], 0 }
   0x5   :  { %13 = vsyncpa [#allocation4], 0 }
   0x6   :  { %15 = vsyncpa [#allocation4 + $0x1], 0  ;;  %s830_s15 = smov 0   ;;  %s832_s16 = smov 0  }
   0x7   :  { %s834_s17 = smov 0   ;;  %s836_s18 = smov 0  }
   0x8   :  { %s838_s19 = smov 0   ;;  %s840_s20 = smov 0  }
   0x9 LB: > { %s529_s21 = sadd.s32 4294967295, %s796_s20   ;;  %s530_s22 = sadd.s32 4294967294, %s796_s20   ;;  %s796_s20 = sphi %s840_s20, %s21_s20   ;;  %s792_s19 = sphi %s838_s19, %s1053_s19   ;;  %s788_s18 = sphi %s836_s18, %s1052_s18   ;;  %s784_s17 = sphi %s834_s17, %s1051_s17   ;;  %s780_s16 = sphi %s832_s16, %s1050_s16   ;;  %s776_s15 = sphi %s830_s15, %s1049_s15  }
   0xa   : > { %s42_s23 = sadd.s32 1, %s784_s17  ;;  %p49_p0 = scmp.ne.s32.totalorder %s784_s17, %s780_s16 }
   0xb   : > { %p50_p1 = scmp.eq.s32.totalorder %s796_s20, 0  ;;  %p55_p2 = scmp.ne.s32.totalorder %s780_s16, %s776_s15 }
   0xc   : > { %p868_p3 = scmp.eq.s32.totalorder %s529_s21, 0  ;;  %p144_p4 = scmp.eq.s32.totalorder %s529_s21, 1 }
   0xd   : > { %p872_p5 = por %p50_p1, %p49_p0  ;;  %p150_p6 = scmp.eq.s32.totalorder %s530_s22, 1 }
   0xe   : > { %p878_p7 = por %p868_p3, %p55_p2  ;;  %p882_p8 = por %p144_p4, %p49_p0 }
   0xf   : > { %p886_p9 = por %p150_p6, %p55_p2  ;;  %p531_p10 = scmp.ge.s32.totalorder %s796_s20, 1 }
  0x10   : > { %s1036_s26 = scalar_select %p878_p7, 1, 0 }
  0x11   : > { %s1037_s27 = scalar_select %p882_p8, 1, 0 }
  0x12   : > { %s1038_s28 = scalar_select %p886_p9, 1, 0 }
  0x13   : > { %p157_p11 = scmp.lt.s32.totalorder %s796_s20, 3  ;;  %s798_s30 = smov [#allocation5]  }
  0x14   : > { %s170_s5 = sshll.u32 %s798_s30, 4  ;;  %p598_p1 = scmp.lt.s32.totalorder %s796_s20, 2  ;;  %s171_s5 = int_to_ptr.vmem [resolvable:$true] %s170_s5 }
  0x15   : > { %p893_p13 = pnand %p531_p10, %p157_p11  ;;  %s33_s8 = sadd.s32 1, %s792_s19 }
  0x16   : > { %p902_p4 = pnand %p598_p1, %p872_p5  ;;  %p35_p6 = scmp.ge.s32.totalorder %s33_s8, 2 }
  0x17   : > { %p585_p0 = pneg %p893_p13  ;;  %s187_s9 = sand.u32 1, %s784_s17  }
  0x18   : > { %s669_s10 = scalar_lea.vmem %s171_s5, 64  ;;  %p677_p8 = scmp.lt.s32.totalorder %s171_s5, %s171_s5 }
  0x19   : > { %p908_p2 = pnand %p585_p0, %p868_p3  ;;  %p670_p11 = scmp.ne.s32.totalorder %s171_s5, %s669_s10 }
  0x1a   : > { %p678_p5 = scmp.lt.s32.totalorder %s669_s10, %s669_s10 }
  0x1b   : > { %p660_p10 = pneg %p908_p2 }
  0x1c   : > { %p679_p1 = por %p678_p5, %p677_p8 }
  0x1d   : > { %p672_p12 = pnand %p670_p11, %p660_p10 }
  0x1f   : > { %p673_p9 = pneg %p672_p12 }
  0x21   : > { %p680_p7 = pnand %p679_p1, %p673_p9 }
  0x23   : > { %683 = shalt.err (!%p680_p7)
}
  0x24   : > { %s1042_s1 = sld [smem:[#allocation12_spill]]  ;;  %s1055_s8 = smov (%p35_p6, %s33_s8), 0 }
  0x25   : > { %1043 = sst [smem:[#allocation11_spill]] %s1055_s8  ;;  %s534_s13 = sshll.u32 %s187_s9, 5 }
  0x26   : > { %s37_s14 = ssub.s32 %s792_s19, %s1055_s8  ;;  %s556_s21 = sshll.u32 %s792_s19, 9 }
  0x27   : > { %p40_p12 = scmp.eq.s32.totalorder %s37_s14, 0  ;;  %s199_s30 = scalar_lea.hbm %s1025_s0, %s556_s21 }
  0x28   : > { %s191_s7 = scalar_lea.vmem [#allocation2], %s534_s13  ;;  %s188_s12 = scalar_lea.sflag [#allocation3], %s187_s9 }
  0x29   : > { %s200_s10 = sshll.u32 %s191_s7, 4  ;;  %p686_p7 = pneg %p902_p4  ;;  %s201_s10 = int_to_ptr.vmem [resolvable:$true] %s200_s10 }
  0x2a   : > { %588 = dma.hbm_to_vmem [thread:$0]  (!%p908_p2), %s1042_s1, 64, %s171_s5, [#allocation6]  }
  0x2b   : > { %s932_s11 = scalar_select %p40_p12, %s784_s17, %s42_s23  }
  0x2c   : > { %s697_s5 = scalar_lea.vmem %s201_s10, 512  ;;  %s799_s1 = smov [#allocation2]  }
  0x2d   : > { %p698_p8 = scmp.ne.s32.totalorder %s201_s10, %s697_s5  ;;  %s702_s14 = sshll.u32 %s799_s1, 4  ;;  %s703_s14 = int_to_ptr.vmem [resolvable:$false] %s702_s14 }
  0x2e   : > { %s704_s8 = scalar_lea.vmem %s703_s14, 1024  ;;  %p705_p2 = scmp.lt.s32.totalorder %s201_s10, %s703_s14 }
  0x2f   : > { %p700_p9 = pnand %p698_p8, %p686_p7  ;;  %p706_p6 = scmp.lt.s32.totalorder %s704_s8, %s697_s5 }
  0x31   : > { %p701_p0 = pneg %p700_p9  ;;  %p707_p10 = por %p706_p6, %p705_p2 }
  0x33   : > { %p708_p11 = pnand %p707_p10, %p701_p0 }
  0x35   : > { %711 = shalt.err (!%p708_p11)
}
  0x36   : > { %s800_s13 = smov 64   ;;  %s801_s23 = smov 4  }
  0x37   : > { %592 = dma.hbm_to_vmem [thread:$0]  (!%p902_p4), %s199_s30, 512, %s201_s10, %s188_s12, %s800_s13, %s800_s13, %s801_s23  }
  0x38   : > { %212 = sbr.rel (%p893_p13) target bundleno = 291 (0x123), region = 36  ;;  %s941_s9 = sand.u32 (!%p893_p13), 1, %s780_s16  }
  0x39   : > { %s538_s1 = sshll.u32 (!%p893_p13), %s941_s9, 5  ;;  %s215_s8 = scalar_lea.sflag (!%p893_p13), [#allocation3], %s941_s9 }
  0x3a   : > { %s218_s21 = scalar_lea.vmem (!%p893_p13), [#allocation2], %s538_s1  ;;  %p1044_p5 = scmp.ne.s32.totalorder (!%p893_p13), %s1036_s26, 0 }
  0x3d   : > { %763 = dma.done.wait (%p1044_p5), %s215_s8, 512  }
  0x3e   : > { %765 = vsyncadd (%p1044_p5), %s215_s8, 4294966784 }
  0x3f   : > { %767 = dma.done.wait (%p868_p3), [#allocation6], 64  }
  0x40   : > { %769 = vsyncadd (%p868_p3), [#allocation6], 4294967232  ;;  %vm292_vm0 = vcmask 1043456   ;;  %vm279_vm1 = vcmask 64512   ;;  %v258_v0 = vld [vmem:[#allocation5] sm:$0xf] }
  0x41   : > { %575 = vmatprep.subr.msk.bf16.mxu0 %vm292_vm0, %v258_v0  ;;  %576 = vmatprep.subr.msk.bf16.mxu1 %vm292_vm0, %v258_v0  ;;  %v294_v1 = vsel %vm292_vm0, %v258_v0, 0  ;;  %v654_v2 = vld [vmem:[%s218_s21] sm:$0xff]   ;;  %v655_v3 = vld [vmem:[%s218_s21 + $0x10] sm:$0xff]   ;;  %v656_v4 = vld [vmem:[%s218_s21 + $0x8] sm:$0xff]   ;;  %vm407_vm2 = vcmask 257024   ;;  %s246_s22 = scalar_lea.vmem [#allocation7], %s538_s1 }
  0x42   : > { %564 = vmatpush3.bf16.msra.mxu0 %v294_v1  ;;  %574 = vmatpush3.bf16.msra.mxu1 %v294_v1  ;;  %v657_v5 = vld [vmem:[%s218_s21 + $0x18] sm:$0xff]   ;;  %v549_v6 = vld [vmem:[%s1027_s2] ss:$0 sm:$0xff]  ;;  %s557_s25 = sshll.u32 %s788_s18, 9  ;;  %s432_s30 = sshll.u32 %s246_s22, 4  ;;  %s974_s30 = int_to_ptr.vmem [resolvable:$true] %s432_s30 }
  0x43   : > { %565 = vmatprep.mubr.msk.bf16.mxu0 %vm279_vm1, %v654_v2  ;;  %569 = vmatprep.mubr.msk.bf16.mxu1 %vm279_vm1, %v655_v3  ;;  %v550_v8 = vld [vmem:[%s1028_s3] ss:$0 sm:$0xff]  ;;  %s972_s12 = scalar_lea.hbm %s1029_s4, %s557_s25  ;;  %s417_s18 = scalar_lea.sflag [#allocation4], %s941_s9 }
  0x44   : > { %s712_s5 = scalar_lea.vmem %s974_s30, 512  ;;  %p1045_p13 = scmp.ne.s32.totalorder %s1037_s27, 0 }
  0x45   : > { %566 = vmatmul.mubr.msk.bf16.vlgmr.msra.gmra.mxu0 %vm279_vm1, %v656_v4  ;;  %570 = vmatmul.mubr.msk.bf16.vlgmr.msra.gmra.mxu1 %vm279_vm1, %v657_v5  ;;  %p713_p3 = scmp.ne.s32.totalorder %s974_s30, %s712_s5  ;;  %s802_s14 = smov [#allocation7]  }
  0x46   : > { %s716_s13 = sshll.u32 %s802_s14, 4  ;;  %s717_s13 = int_to_ptr.vmem [resolvable:$false] %s716_s13 }
  0x47   : > { %p714_p4 = pnand %p713_p3, %p1045_p13  ;;  %s718_s23 = scalar_lea.vmem %s717_s13, 1024 }
  0x48   : > { %p719_p12 = scmp.lt.s32.totalorder %s974_s30, %s717_s13  ;;  %p720_p7 = scmp.lt.s32.totalorder %s718_s23, %s712_s5 }
  0x49   : > { %p715_p1 = pneg %p714_p4 }
  0x4a   : > { %p721_p8 = por %p720_p7, %p719_p12 }
  0x4c   : > { %p722_p9 = pnand %p721_p8, %p715_p1 }
 0x105   : > { %v567_v7 = vpop.f32.mrf.mxu0  ;;  %v571_v10 = vpop.f32.mrf.mxu1 }
 0x106   : > { %v370_v9 = vmul.f32 %v567_v7, %v549_v6  ;;  %v374_v11 = vmul.f32 %v571_v10, %v549_v6 }
 0x107   : > { %v330_v12 = vpop.f32.mrf.mxu0  ;;  %v346_v15 = vpop.f32.mrf.mxu1 }
 0x108   : > { %v385_v13 = vadd.f32 %v550_v8, %v370_v9  ;;  %v368_v14 = vmul.f32 %v549_v6, %v330_v12  ;;  %v389_v16 = vadd.f32 %v550_v8, %v374_v11  ;;  %v372_v17 = vmul.f32 %v549_v6, %v346_v15 }
 0x109   : > { %v568_v18 = vpop.f32.mrf.mxu0  ;;  %v572_v22 = vpop.f32.mrf.mxu1 }
 0x10a   : > { %v393_v19 = vmax.f32 %v385_v13, 0.0  ;;  %v383_v20 = vadd.f32 %v550_v8, %v368_v14  ;;  %v371_v21 = vmul.f32 %v568_v18, %v549_v6  ;;  %v397_v23 = vmax.f32 %v389_v16, 0.0 }
 0x10b   : > { %v387_v24 = vadd.f32 %v550_v8, %v372_v17  ;;  %v375_v25 = vmul.f32 %v572_v22, %v549_v6  ;;  %v333_v26 = vpop.f32.mrf.mxu0  ;;  %v349_v31 = vpop.f32.mrf.mxu1 }
 0x10c   : > { %v401_v27 = vpack.c.bf16 %v393_v19, %v393_v19  ;;  %v391_v28 = vmax.f32 %v383_v20, 0.0  ;;  %v386_v29 = vadd.f32 %v550_v8, %v371_v21  ;;  %v369_v30 = vmul.f32 %v549_v6, %v333_v26 }
 0x10d   : > { %v405_v32 = vpack.c.bf16 %v397_v23, %v397_v23  ;;  %v395_v33 = vmax.f32 %v387_v24, 0.0  ;;  %v390_v34 = vadd.f32 %v550_v8, %v375_v25  ;;  %v373_v35 = vmul.f32 %v549_v6, %v349_v31 }
 0x10e   : > { %410 = vst.msk [vmem:[%s246_s22 + $0x8] sm:$0xf] %vm407_vm2, %v401_v27  ;;  %v399_v36 = vpack.c.bf16 %v391_v28, %v391_v28  ;;  %v394_v37 = vmax.f32 %v386_v29, 0.0  ;;  %v384_v38 = vadd.f32 %v550_v8, %v369_v30 }
 0x10f   : > { %414 = vst.msk [vmem:[%s246_s22 + $0x18] sm:$0xf] %vm407_vm2, %v405_v32  ;;  %v403_v39 = vpack.c.bf16 %v395_v33, %v395_v33  ;;  %v398_v40 = vmax.f32 %v390_v34, 0.0  ;;  %v388_v41 = vadd.f32 %v550_v8, %v373_v35 }
 0x110   : > { %408 = vst.msk [vmem:[%s246_s22] sm:$0xf] %vm407_vm2, %v399_v36  ;;  %v402_v42 = vpack.c.bf16 %v394_v37, %v394_v37  ;;  %v392_v43 = vmax.f32 %v384_v38, 0.0 }
 0x111   : > { %412 = vst.msk [vmem:[%s246_s22 + $0x10] sm:$0xf] %vm407_vm2, %v403_v39  ;;  %v406_v44 = vpack.c.bf16 %v398_v40, %v398_v40  ;;  %v396_v45 = vmax.f32 %v388_v41, 0.0 }
 0x112   : > { %411 = vst.msk [vmem:[%s246_s22 + $0xc] sm:$0xf] %vm407_vm2, %v402_v42  ;;  %v400_v46 = vpack.c.bf16 %v392_v43, %v392_v43 }
 0x113   : > { %415 = vst.msk [vmem:[%s246_s22 + $0x1c] sm:$0xf] %vm407_vm2, %v406_v44  ;;  %v404_v47 = vpack.c.bf16 %v396_v45, %v396_v45 }
 0x114   : > { %409 = vst.msk [vmem:[%s246_s22 + $0x4] sm:$0xf] %vm407_vm2, %v400_v46 }
 0x115   : > { %413 = vst.msk [vmem:[%s246_s22 + $0x14] sm:$0xf] %vm407_vm2, %v404_v47 }
 0x116   : > { %725 = shalt.err (!%p722_p9)
}
 0x117   : > { %s726_s1 = scalar_lea.hbm %s972_s12, 512  ;;  %s730_s26 = scalar_lea.hbm %s1029_s4, 1024 }
 0x118   : > { %p727_p0 = scmp.ne.s32.totalorder %s972_s12, %s726_s1  ;;  %p731_p10 = scmp.lt.s32.totalorder %s972_s12, %s1029_s4 }
 0x119   : > { %p732_p11 = scmp.lt.s32.totalorder %s730_s26, %s726_s1 }
 0x11a   : > { %p728_p2 = pnand %p727_p0, %p1045_p13 }
 0x11b   : > { %p733_p5 = por %p732_p11, %p731_p10 }
 0x11c   : > { %p729_p6 = pneg %p728_p2 }
 0x11e   : > { %p734_p3 = pnand %p733_p5, %p729_p6 }
 0x120   : > { %737 = shalt.err (!%p734_p3)
}
 0x121   : > { %s803_s6 = smov 64   ;;  %s804_s22 = smov 4  }
 0x122   : > { %583 = dma.vmem_to_hbm [thread:$0]  (%p1045_p13), %s974_s30, 512, %s972_s12, %s417_s18, %s803_s6, %s803_s6, %s804_s22  }
 0x123 PF: > { %s447_s25 = sand.u32 1, %s776_s15   ;;  %p1046_p4 = scmp.ne.s32.totalorder %s1038_s28, 0 }
 0x124   : > { %p1047_p1 = scmp.ge.s32.totalorder %s796_s20, 2  ;;  %s448_s7 = scalar_lea.sflag [#allocation4], %s447_s25 }
 0x126   : > { %p594_p12 = pnand %p1047_p1, %p1046_p4 }
 0x128   : > { %p595_p7 = pneg %p594_p12 }
 0x12a   : > { %771 = dma.done.wait (%p595_p7), %s448_s7, 512  }
 0x12b   : > { %773 = vsyncadd (%p595_p7), %s448_s7, 4294966784  ;;  %s21_s20 = sadd.s32 1, %s796_s20   ;;  %s1048_s27 = sld [smem:[#allocation11_spill]] }
 0x12c   : > { %p18_p8 = scmp.ge.s32.totalorder %s21_s20, 4   ;;  %s1049_s15 = smov %s780_s16 }
 0x12d   : > { %s1050_s16 = smov %s784_s17  ;;  %s1051_s17 = smov %s932_s11 }
 0x12e   : > { %s1052_s18 = smov %s792_s19  ;;  %20 = sbr.rel (!%p18_p8) target bundleno = 9 (0x9), region = 85 }
 0x131   : > { %s1053_s19 = smov %s1048_s27 }
 0x133   :  { %453 = vsyncpa [#allocation3], 1 }
 0x134   :  { %455 = vsyncpa [#allocation3 + $0x1], 1 }
 0x135   :  { %456 = vsyncpa [#allocation6], 1 }
 0x136   :  { %457 = vsyncpa [#allocation4], 1 }
 0x137   :  { %459 = vsyncpa [#allocation4 + $0x1], 1 }

</bundles_post_ra>
